<compile_context>
chip_gen: v7x
topology: tpu7x:2x2x1
jax: 0.10.0
libtpu: 0.0.40
codegen_flags: <defaults>
</compile_context>

<pallas_src>
import jax
import jax.numpy as jnp
from jax.experimental import pallas as pl
from jax.experimental.pallas import tpu as pltpu

LANE = 128   # TPU vreg lane width
SUBLANE = 8  # TPU vreg sublane width


def _round_up(n, m):
    return ((n + m - 1) // m) * m


def _pad2d(a, rows, cols):
    r, c = a.shape
    if r == rows and c == cols:
        return a
    return jnp.pad(a, ((0, rows - r), (0, cols - c)))


def _net_kernel(x_ref, w1_ref, b1_ref, w2_ref, b2_ref, out_ref):
    """fc1 -> ReLU -> out for one batch tile.

    x_ref:  (TB, n_s)      input tile (f32 or bf16, as supplied)
    w1_ref: (n_s, HID_P)   fc1 weight, hidden padded to 128 lanes
    b1_ref: (1, HID_P)     fc1 bias, padded (f32)
    w2_ref: (HID_P, NA_P)  out weight, both dims padded to 128
    b2_ref: (1, n_a)       out bias, NOT padded
    out_ref:(TB, n_a)      narrow output -> only real columns hit HBM
    """
    n_a = out_ref.shape[-1]
    # fc1 on the MXU, f32 accumulate.
    h = jnp.dot(x_ref[...], w1_ref[...], preferred_element_type=jnp.float32)
    # bias + ReLU in f32 on the VPU, lane-dense (padded hidden cols stay 0).
    h = jnp.maximum(h + b1_ref[...], 0.0)
    # out layer on the MXU with a clean 128x128 weight tile, f32 accumulate.
    y = jnp.dot(h.astype(w2_ref.dtype), w2_ref[...],
                preferred_element_type=jnp.float32)
    # Store only the real n_a columns: a few masked stores per tile, but HBM
    # writeback drops from 512 B/row to 4*n_a B/row.
    out_ref[...] = (y[:, :n_a] + b2_ref[...]).astype(out_ref.dtype)


def net_forward(x, w1_t, b1, w2_t, b2, *, block_b=4096):
    """Forward pass y = relu(x @ W1 + b1) @ W2 + b2. Returns (B, n_a) float32.

    x: (B, n_s); w1_t: (n_s, 50); b1: (1, 50); w2_t: (50, n_a); b2: (1, n_a).
    The kernel streams x in whatever dtype it arrives in (supply bf16 x
    upstream to halve input HBM traffic; weights follow x's dtype).
    """
    B, n_s = x.shape
    hidden = w1_t.shape[1]
    n_a = w2_t.shape[1]

    hid_p = _round_up(hidden, LANE)   # 50 -> 128 (lane-dense intermediate)
    na_p = _round_up(n_a, LANE)       # 2  -> 128 (lane-dense MXU tile only)

    stream_dtype = x.dtype            # no wrapper-side cast of x

    # Zero padding is exact: padded hidden cols stay 0 through bias+ReLU and
    # padded W2 rows/cols contribute 0; only real columns are ever stored.
    w1_p = _pad2d(w1_t.astype(stream_dtype), n_s, hid_p)   # (n_s, 128)
    b1_p = _pad2d(b1.astype(jnp.float32), 1, hid_p)        # (1, 128)
    w2_p = _pad2d(w2_t.astype(stream_dtype), hid_p, na_p)  # (128, 128)
    b2_n = b2.astype(jnp.float32)                          # (1, n_a) narrow

    x_bytes = jnp.dtype(stream_dtype).itemsize
    cost = pl.CostEstimate(
        flops=2 * B * (n_s * hid_p + hid_p * na_p),
        transcendentals=0,
        bytes_accessed=(B * n_s * x_bytes                       # streamed x
                        + (n_s * hid_p + hid_p * na_p) * x_bytes  # weights
                        + (hid_p + n_a) * 4                       # biases
                        + B * n_a * 4),                           # narrow out
    )

    if B <= block_b:
        # ---- tiny/moderate batch: grid-less, whole arrays in VMEM --------
        # Dispatch-latency bound; no pipelining machinery, no padding passes.
        vmem = pl.BlockSpec(memory_space=pltpu.MemorySpace.VMEM)
        return pl.pallas_call(
            _net_kernel,
            out_shape=jax.ShapeDtypeStruct((B, n_a), jnp.float32),
            in_specs=[vmem, vmem, vmem, vmem, vmem],
            out_specs=vmem,
            cost_estimate=cost,
        )(x, w1_p, b1_p, w2_p, b2_n)

    # ---- large-batch path: batch-tiled grid, weights VMEM-resident ------
    # Balance across >= 2 blocks so the "parallel" axis shards over both v7x
    # TensorCores; cap the tile at block_b (default 4096 keeps the streamed
    # x tile + lane-dense intermediates far below the 32 MiB scoped VMEM).
    eff_tb = min(block_b, _round_up(pl.cdiv(B, 2), 512))
    eff_tb = _round_up(max(eff_tb, SUBLANE), SUBLANE)
    n_blocks = pl.cdiv(B, eff_tb)   # ragged last block handled by Pallas

    return pl.pallas_call(
        _net_kernel,
        out_shape=jax.ShapeDtypeStruct((B, n_a), jnp.float32),
        grid=(n_blocks,),
        in_specs=[
            pl.BlockSpec((eff_tb, n_s), lambda i: (i, 0)),   # streamed x
            pl.BlockSpec((n_s, hid_p), lambda i: (0, 0)),    # resident W1
            pl.BlockSpec((1, hid_p), lambda i: (0, 0)),      # resident b1
            pl.BlockSpec((hid_p, na_p), lambda i: (0, 0)),   # resident W2
            pl.BlockSpec((1, n_a), lambda i: (0, 0)),        # resident b2
        ],
        out_specs=pl.BlockSpec((eff_tb, n_a), lambda i: (i, 0)),  # narrow out
        compiler_params=pltpu.CompilerParams(
            dimension_semantics=("parallel",),
        ),
        cost_estimate=cost,
    )(x, w1_p, b1_p, w2_p, b2_n)


def init_params(key, n_s, n_a, hidden=50):
    """Matches the PyTorch module's init: weights ~ N(0, 0.1); biases use
    nn.Linear's default uniform init."""
    k1, k2, k3, k4 = jax.random.split(key, 4)
    # PyTorch weight shape is (out, in); store transposed as (in, out).
    w1_t = (0.1 * jax.random.normal(k1, (hidden, n_s), jnp.float32)).T
    w2_t = (0.1 * jax.random.normal(k2, (n_a, hidden), jnp.float32)).T
    bound1 = 1.0 / jnp.sqrt(jnp.float32(n_s))
    bound2 = 1.0 / jnp.sqrt(jnp.float32(hidden))
    b1 = jax.random.uniform(k3, (1, hidden), jnp.float32, -bound1, bound1)
    b2 = jax.random.uniform(k4, (1, n_a), jnp.float32, -bound2, bound2)
    return w1_t, b1, w2_t, b2


if __name__ == "__main__":
    # Small shapes consistent with a DQN state/action net (CartPole-ish).
    batch, n_s, n_a = 8, 4, 2
    key = jax.random.PRNGKey(0)
    kx, kp = jax.random.split(key)

    x = jax.random.normal(kx, (batch, n_s), jnp.float32)
    w1_t, b1, w2_t, b2 = init_params(kp, n_s, n_a)

    def ref_fn(xs):
        return jnp.maximum(xs.astype(jnp.float32) @ w1_t + b1, 0.0) @ w2_t + b2

    # 1) Tiny-batch, grid-less path.
    out = net_forward(x, w1_t, b1, w2_t, b2)
    jax.block_until_ready(out)
    assert out.shape == (batch, n_a)
    assert jnp.allclose(out, ref_fn(x), atol=1e-5, rtol=1e-5)

    # 2) Batch-tiled path: narrow (B, n_a) writeback, resident weights,
    #    "parallel" batch axis with >= 2 blocks (small block_b to exercise it).
    big_b = 1024
    xb = jax.random.normal(jax.random.PRNGKey(1), (big_b, n_s), jnp.float32)
    out_b = net_forward(xb, w1_t, b1, w2_t, b2, block_b=256)
    jax.block_until_ready(out_b)
    assert out_b.shape == (big_b, n_a)
    assert jnp.allclose(out_b, ref_fn(xb), atol=1e-4, rtol=1e-4)

    # 3) bf16 activations supplied upstream (no wrapper cast): kernel streams
    #    bf16 x/weights, accumulates in f32.  Looser tolerance is intentional;
    #    note for DQN argmax comparisons bf16 Q-value gaps can flip ties.
    xb_bf = xb.astype(jnp.bfloat16)
    out_bf = net_forward(xb_bf, w1_t, b1, w2_t, b2, block_b=256)
    jax.block_until_ready(out_bf)
    assert out_bf.shape == (big_b, n_a)
    assert jnp.allclose(out_bf, ref_fn(xb), atol=5e-2, rtol=5e-2)

    print("KERNEL_OK")
</pallas_src>

<mosaic_0001>
module attributes {stable_mosaic.version = 11 : i64} {
  func.func @_net_kernel(%arg0: memref<8x4xf32, #tpu.memory_space<vmem>>, %arg1: memref<4x128xf32, #tpu.memory_space<vmem>>, %arg2: memref<1x128xf32, #tpu.memory_space<vmem>>, %arg3: memref<128x128xf32, #tpu.memory_space<vmem>>, %arg4: memref<1x2xf32, #tpu.memory_space<vmem>>, %arg5: memref<8x2xf32, #tpu.memory_space<vmem>>) attributes {dimension_semantics = [], scalar_prefetch = 0 : i64, scratch_operands = 0 : i64, tpu.core_type = #tpu.core_type<tc>} {
    %c0 = arith.constant 0 : index
    %c0_0 = arith.constant 0 : index
    %0 = vector.load %arg0[%c0, %c0_0] : memref<8x4xf32, #tpu.memory_space<vmem>>, vector<8x4xf32>
    %c0_1 = arith.constant 0 : index
    %c0_2 = arith.constant 0 : index
    %1 = vector.load %arg1[%c0_1, %c0_2] : memref<4x128xf32, #tpu.memory_space<vmem>>, vector<4x128xf32>
    %cst = arith.constant dense<0.000000e+00> : vector<8x128xf32>
    %2 = tpu.matmul %0, %1, %cst {dimension_numbers = #tpu.dot_dimension_numbers<[1], [0], [0], [1], [0, 0, 1, 1], [], []>} : vector<8x4xf32>, vector<4x128xf32>, vector<8x128xf32> -> vector<8x128xf32>
    %c0_3 = arith.constant 0 : index
    %c0_4 = arith.constant 0 : index
    %3 = vector.load %arg2[%c0_3, %c0_4] : memref<1x128xf32, #tpu.memory_space<vmem>>, vector<1x128xf32>
    %4 = vector.broadcast %3 : vector<1x128xf32> to vector<8x128xf32>
    %5 = arith.addf %2, %4 : vector<8x128xf32>
    %cst_5 = arith.constant 0.000000e+00 : f32
    %6 = vector.broadcast %cst_5 : f32 to vector<8x128xf32>
    %7 = arith.maximumf %5, %6 : vector<8x128xf32>
    %c0_6 = arith.constant 0 : index
    %c0_7 = arith.constant 0 : index
    %8 = vector.load %arg3[%c0_6, %c0_7] : memref<128x128xf32, #tpu.memory_space<vmem>>, vector<128x128xf32>
    %cst_8 = arith.constant dense<0.000000e+00> : vector<8x128xf32>
    %9 = tpu.matmul %7, %8, %cst_8 {dimension_numbers = #tpu.dot_dimension_numbers<[1], [0], [0], [1], [0, 0, 1, 1], [], []>} : vector<8x128xf32>, vector<128x128xf32>, vector<8x128xf32> -> vector<8x128xf32>
    %10 = vector.extract_strided_slice %9 {offsets = [0, 0], sizes = [8, 2], strides = [1, 1]} : vector<8x128xf32> to vector<8x2xf32>
    %c0_9 = arith.constant 0 : index
    %c0_10 = arith.constant 0 : index
    %11 = vector.load %arg4[%c0_9, %c0_10] : memref<1x2xf32, #tpu.memory_space<vmem>>, vector<1x2xf32>
    %12 = vector.broadcast %11 : vector<1x2xf32> to vector<8x2xf32>
    %13 = arith.addf %10, %12 : vector<8x2xf32>
    %c0_11 = arith.constant 0 : index
    %c0_12 = arith.constant 0 : index
    %14 = vector.load %arg5[%c0_11, %c0_12] : memref<8x2xf32, #tpu.memory_space<vmem>>, vector<8x2xf32>
    tpu.vector_store %arg5[%c0_11, %c0_12], %13 {strides = array<i32>} : memref<8x2xf32, #tpu.memory_space<vmem>>, vector<8x2xf32>,
    return
  }
}

</mosaic_0001>

<bundles_post_ra>
// kernel: tpu_custom_call.1
= control target key start
LH: loop header
LB: loop body
LE: loop exit
PB: predicated region body
PF: predicated region fallthrough
CT: control target
= control target key end

     0   :  { %10 = vsyncpa [#allocation3], 0  ;;  %s340_s18 = smov [#allocation2]   ;;  %s403_s0 = inlined_call_operand.vmem [shape: f32[8,4], index: 0, kind: input, shape index: {}]   ;;  %s404_s1 = inlined_call_operand.vmem [shape: f32[4,128], index: 1, kind: input, shape index: {}]   ;;  %s405_s2 = inlined_call_operand.vmem [shape: f32[1,128], index: 2, kind: input, shape index: {}]   ;;  %s406_s3 = inlined_call_operand.hbm [shape: f32[128,128], index: 3, kind: input, shape index: {}]   ;;  %s407_s4 = inlined_call_operand.vmem [shape: f32[1,2], index: 4, kind: input, shape index: {}]   ;;  %s408_s5 = inlined_call_operand.vmem [shape: f32[8,2], index: 5, kind: output, shape index: {}]  }
   0x1   :  { %s22_s19 = sshll.u32 %s340_s18, 4  ;;  %s316_s22 = scalar_lea.hbm %s406_s3, 2048  ;;  %s23_s19 = int_to_ptr.vmem [resolvable:$true] %s22_s19 }
   0x2   :  { %p317_p0 = scmp.ne.s32.totalorder %s406_s3, %s316_s22  ;;  %p320_p1 = scmp.lt.u32.totalorder %s316_s22, %s406_s3 }
   0x4   :  { %p322_p2 = pnand %p320_p1, %p317_p0 }
   0x6   :  { %325 = shalt.err (!%p322_p2)
}
   0x7   :  { %s326_s27 = scalar_lea.vmem %s23_s19, 2048  ;;  %p331_p4 = scmp.lt.s32.totalorder %s23_s19, %s23_s19 }
   0x8   :  { %p327_p3 = scmp.ne.s32.totalorder %s23_s19, %s326_s27  ;;  %p332_p5 = scmp.lt.s32.totalorder %s326_s27, %s326_s27 }
   0xa   :  { %p333_p6 = por %p332_p5, %p331_p4 }
   0xc   :  { %p334_p7 = pnand %p333_p6, %p327_p3 }
   0xe   :  { %337 = shalt.err (!%p334_p7)
}
   0xf   :  { %s341_s28 = smov 128   ;;  %s342_s29 = smov 8  }
  0x10   :  { %28 = dma.hbm_to_vmem [thread:$0]  %s406_s3, 2048, %s23_s19, [#allocation3], %s341_s28, %s341_s28, %s342_s29  }
  0x11   :  { %338 = dma.done.wait [#allocation3], 2048  }
  0x12   :  { %339 = vsyncadd [#allocation3], 4294965248  ;;  %v343_v0 = vmov 0.0   ;;  %vm344_vm0 = vmmov 0   ;;  %v345_v1 = vmov 0.0|0.0   ;;  %vm47_vm1 = vcmask 1043456  }
  0x13   :  { %246 = vmatprep.subr.mxu0 %v343_v0  ;;  %248 = vmatprep.mubr.msk.f32.mxu0 %vm344_vm0, %v343_v0  ;;  %vm43_vm2 = vcmask 31744   ;;  %v35_v2 = vld [vmem:[%s404_s1] sm:$0xf]  ;;  %v123_v5 = vld [vmem:[#allocation2 + $0x8] sm:$0xff]  ;;  %v124_v6 = vld [vmem:[#allocation2 + $0x10] sm:$0xff]  ;;  %vm216_vm3 = vcmask 15360  }
  0x14   :  { %286 = vmatprep.subr.bf16.mxu1 %v345_v1  ;;  %283 = vmatprep.mubr.msk.f32.mxu1 %vm344_vm0, %v343_v0  ;;  %v34_v3 = vld [vmem:[%s403_s0] sm:$0xff]  ;;  %v125_v7 = vld [vmem:[#allocation2 + $0x18] sm:$0xff]  ;;  %v127_v11 = vld [vmem:[#allocation2 + $0x28] sm:$0xff] }
  0x15   :  { %v122_v4 = vld [vmem:[#allocation2] sm:$0xff]  ;;  %247 = vmatpush3.msk.msra.mxu0 %vm47_vm1, %v35_v2  ;;  %v290_v9 = vpack.c.bf16 %v125_v7, %v124_v6  ;;  %v128_v13 = vld [vmem:[#allocation2 + $0x30] sm:$0xff]  ;;  %v129_v14 = vld [vmem:[#allocation2 + $0x38] sm:$0xff] }
  0x16   :  { %249 = vmatmul.mubr.msk.f32.vlgmr.msra.gmra.mrb[0].mxu0 %vm43_vm2, %v34_v3  ;;  %v287_v8 = vpack.c.bf16 %v123_v5, %v122_v4  ;;  %v126_v10 = vld [vmem:[#allocation2 + $0x20] sm:$0xff]  ;;  %v296_v15 = vpack.c.bf16 %v129_v14, %v128_v13  ;;  %v131_v17 = vld [vmem:[#allocation2 + $0x48] sm:$0xff]  ;;  %v132_v19 = vld [vmem:[#allocation2 + $0x50] sm:$0xff] }
  0x17   :  { %v293_v12 = vpack.c.bf16 %v127_v11, %v126_v10  ;;  %v130_v16 = vld [vmem:[#allocation2 + $0x40] sm:$0xff]  ;;  %v133_v20 = vld [vmem:[#allocation2 + $0x58] sm:$0xff]  ;;  %v135_v23 = vld [vmem:[#allocation2 + $0x68] sm:$0xff] }
  0x18   :  { %288 = vmatpush3.bf16.msra.mxu1 %v287_v8  ;;  %v299_v18 = vpack.c.bf16 %v131_v17, %v130_v16  ;;  %v302_v21 = vpack.c.bf16 %v133_v20, %v132_v19  ;;  %v134_v22 = vld [vmem:[#allocation2 + $0x60] sm:$0xff]  ;;  %v136_v25 = vld [vmem:[#allocation2 + $0x70] sm:$0xff]  ;;  %v137_v26 = vld [vmem:[#allocation2 + $0x78] sm:$0xff] }
  0x19   :  { %289 = vmatprep.subr.bf16.mxu1 %v345_v1  ;;  %v305_v24 = vpack.c.bf16 %v135_v23, %v134_v22  ;;  %v308_v27 = vpack.c.bf16 %v137_v26, %v136_v25  ;;  %v223_v28 = vld [vmem:[%s405_s2] ss:$0 sm:$0xff] }
  0x1a   :  { %v226_v33 = vld [vmem:[%s407_s4] ss:$0 sm:$0xff] }
  0x1c   :  { %291 = vmatpush3.bf16.msra.mxu1 %v290_v9 }
  0x1d   :  { %292 = vmatprep.subr.bf16.mxu1 %v345_v1 }
  0x20   :  { %294 = vmatpush3.bf16.msra.mxu1 %v293_v12 }
  0x21   :  { %295 = vmatprep.subr.bf16.mxu1 %v345_v1 }
  0x24   :  { %297 = vmatpush3.bf16.msra.mxu1 %v296_v15 }
  0x25   :  { %298 = vmatprep.subr.bf16.mxu1 %v345_v1 }
  0x28   :  { %300 = vmatpush3.bf16.msra.mxu1 %v299_v18 }
  0x29   :  { %301 = vmatprep.subr.bf16.mxu1 %v345_v1 }
  0x2c   :  { %303 = vmatpush3.bf16.msra.mxu1 %v302_v21 }
  0x2d   :  { %304 = vmatprep.subr.bf16.mxu1 %v345_v1 }
  0x30   :  { %306 = vmatpush3.bf16.msra.mxu1 %v305_v24 }
  0x31   :  { %307 = vmatprep.subr.bf16.mxu1 %v345_v1 }
  0x34   :  { %309 = vmatpush3.bf16.msra.mxu1 %v308_v27 }
  0xe9   :  { %v117_v29 = vpop.f32.mrb[0].mxu0 }
  0xea   :  { %v118_v30 = vadd.f32 %v223_v28, %v117_v29  ;;  %v250_v31 = vpop.f32.mrb[1].mxu0 }
  0xec   :  { %v121_v32 = vmax.f32 %v118_v30, 0.0 }
  0xee   :  { %284 = vmatmul.mubr.f32.vlgmr.msra.gmra.mrb[0].mxu1 %v121_v32 }
 0x1c1   :  { %v204_v34 = vpop.f32.mrb[0].mxu1 }
 0x1c2   :  { %v215_v35 = vadd.f32 %v226_v33, %v204_v34  ;;  %v285_v36 = vpop.f32.mrb[1].mxu1 }
 0x1c4   :  { %217 = vst.msk [vmem:[%s408_s5] sm:$0xff] %vm216_vm3, %v215_v35 }
 0x1c5   :  { %222 = vsyncpa [#allocation3], 1 }

</bundles_post_ra>
